<compile_context>
chip_gen: v6e
topology: v6e:2x2x1
jax: 0.10.0
libtpu: 0.0.40
codegen_flags: <defaults>
</compile_context>

<pallas_src>
import functools

import jax
import jax.numpy as jnp
from jax.experimental import pallas as pl
from jax.experimental.pallas import tpu as pltpu


# ----------------------------------------------------------------------------
# Pallas kernels
# ----------------------------------------------------------------------------

def _fused_chain_kernel(x_ref, w1_ref, b1_ref, w2_ref, b2_ref, w3_ref, b3_ref,
                        *rest, relu3, emit_pointfeat):
    """Fused conv1 -> conv2 -> conv3 (+optional ReLU) -> running max over N.

    x_ref : (1, ntile, Cin)   f32
    w1_ref: (1, Cin, 64)      f32   (per-batch when the 3x3 transform is folded)
    w2_ref: (64, 128)         bf16
    w3_ref: (128, 1024)       bf16
    b*_ref: (1, C)            f32   (BN folded)
    outputs: [pf_ref (1, ntile, 64)] , g_ref (1, 1, 1024)
    scratch: acc_ref (1, 1024) f32  (running max)
    """
    if emit_pointfeat:
        pf_ref, g_ref, acc_ref = rest
    else:
        g_ref, acc_ref = rest

    n = pl.program_id(1)

    @pl.when(n == 0)
    def _():
        acc_ref[...] = jnp.full(acc_ref.shape, -jnp.inf, acc_ref.dtype)

    x = x_ref[0]                      # (ntile, Cin) f32
    w1 = w1_ref[0]                    # (Cin, 64)    f32
    cin = x.shape[1]

    # conv1 (+folded BN) + ReLU.  Cin is tiny (3): VPU broadcast-FMAs instead
    # of a K=3 MXU matmul that would leave >97% of the systolic array idle.
    if cin <= 8:
        h1 = x[:, 0:1] * w1[0:1, :]
        for c in range(1, cin):
            h1 = h1 + x[:, c:c + 1] * w1[c:c + 1, :]
    else:
        h1 = jnp.dot(x.astype(jnp.bfloat16), w1.astype(jnp.bfloat16),
                     preferred_element_type=jnp.float32)
    h1 = jnp.maximum(h1 + b1_ref[...], 0.0)          # (ntile, 64) f32

    if emit_pointfeat:
        pf_ref[0] = h1.astype(pf_ref.dtype)

    # conv2 (+folded BN) + ReLU on the MXU (bf16 inputs, f32 accumulate)
    h2 = jnp.dot(h1.astype(jnp.bfloat16), w2_ref[...],
                 preferred_element_type=jnp.float32) + b2_ref[...]
    h2 = jnp.maximum(h2, 0.0)                         # (ntile, 128) f32

    # conv3 (+folded BN) (+ optional ReLU) on the MXU
    h3 = jnp.dot(h2.astype(jnp.bfloat16), w3_ref[...],
                 preferred_element_type=jnp.float32) + b3_ref[...]
    if relu3:
        h3 = jnp.maximum(h3, 0.0)                     # (ntile, 1024) f32

    # fused adaptive max pool: running max over the N axis
    acc_ref[...] = jnp.maximum(acc_ref[...],
                               jnp.max(h3, axis=0, keepdims=True))

    @pl.when(n == pl.num_programs(1) - 1)
    def _():
        g_ref[0] = acc_ref[...].astype(g_ref.dtype)


def _mlp3_kernel(g_ref, w1_ref, b1_ref, w2_ref, b2_ref, w3_ref, b3_ref, o_ref):
    """Fused TNet MLP: fc1+BN+ReLU -> fc2+BN+ReLU -> fc3 (+ identity bias)."""
    h = jnp.dot(g_ref[...].astype(jnp.bfloat16), w1_ref[...],
                preferred_element_type=jnp.float32) + b1_ref[...]
    h = jnp.maximum(h, 0.0)
    h = jnp.dot(h.astype(jnp.bfloat16), w2_ref[...],
                preferred_element_type=jnp.float32) + b2_ref[...]
    h = jnp.maximum(h, 0.0)
    h = jnp.dot(h.astype(jnp.bfloat16), w3_ref[...],
                preferred_element_type=jnp.float32) + b3_ref[...]
    o_ref[...] = h.astype(o_ref.dtype)


# ----------------------------------------------------------------------------
# Wrappers (pallas_call plumbing)
# ----------------------------------------------------------------------------

_VMEM_LIMIT = 32 * 1024 * 1024   # safe on v5e/v6e/v7x scoped-VMEM budgets


def _pick_ntile(n, max_tile=512):
    """Largest N-tile <= max_tile that divides N and is a multiple of 8."""
    if n <= max_tile:
        return n
    t = max_tile - (max_tile % 8)
    while t >= 8:
        if n % t == 0:
            return t
        t -= 8
    return n


def fused_conv_chain(x, w1, b1, w2, b2, w3, b3, *, relu3, emit_pointfeat):
    """x: (B, N, Cin) f32.  Returns global feature (B, 1024) and optionally
    the conv1 point features (B, N, 64)."""
    B, N, Cin = x.shape
    C1 = w1.shape[-1]
    C2 = w2.shape[-1]
    C3 = w3.shape[-1]

    per_batch_w1 = (w1.ndim == 3)
    if not per_batch_w1:
        w1 = w1[None]                    # (1, Cin, C1)
    w1_index = (lambda b, n: (b, 0, 0)) if per_batch_w1 else (lambda b, n: (0, 0, 0))

    ntile = _pick_ntile(N)
    grid = (B, N // ntile)

    in_specs = [
        pl.BlockSpec((1, ntile, Cin), lambda b, n: (b, n, 0)),
        pl.BlockSpec((1, Cin, C1), w1_index),
        pl.BlockSpec((1, C1), lambda b, n: (0, 0)),
        pl.BlockSpec((C1, C2), lambda b, n: (0, 0)),
        pl.BlockSpec((1, C2), lambda b, n: (0, 0)),
        pl.BlockSpec((C2, C3), lambda b, n: (0, 0)),
        pl.BlockSpec((1, C3), lambda b, n: (0, 0)),
    ]

    if emit_pointfeat:
        out_shape = (jax.ShapeDtypeStruct((B, N, C1), x.dtype),
                     jax.ShapeDtypeStruct((B, 1, C3), x.dtype))
        out_specs = (pl.BlockSpec((1, ntile, C1), lambda b, n: (b, n, 0)),
                     pl.BlockSpec((1, 1, C3), lambda b, n: (b, 0, 0)))
    else:
        out_shape = jax.ShapeDtypeStruct((B, 1, C3), x.dtype)
        out_specs = pl.BlockSpec((1, 1, C3), lambda b, n: (b, 0, 0))

    result = pl.pallas_call(
        functools.partial(_fused_chain_kernel, relu3=relu3,
                          emit_pointfeat=emit_pointfeat),
        out_shape=out_shape,
        grid_spec=pltpu.PrefetchScalarGridSpec(
            num_scalar_prefetch=0,
            grid=grid,
            in_specs=in_specs,
            out_specs=out_specs,
            scratch_shapes=[pltpu.VMEM((1, C3), jnp.float32)],
        ),
        compiler_params=pltpu.CompilerParams(
            dimension_semantics=("parallel", "arbitrary"),
            vmem_limit_bytes=_VMEM_LIMIT,
        ),
    )(x, w1, b1, w2, b2, w3, b3)

    if emit_pointfeat:
        pf, g = result
        return pf, g.reshape(B, C3)
    return result.reshape(B, C3)


def tnet_mlp(g, p, kk):
    """Fused fc1+fc2+fc3.  g: (B, 1024) -> (B, kk)."""
    B = g.shape[0]
    return pl.pallas_call(
        _mlp3_kernel,
        out_shape=jax.ShapeDtypeStruct((B, kk), jnp.float32),
    )(g, *p["fc1"], *p["fc2"], *p["fc3"])


# ----------------------------------------------------------------------------
# Parameter construction (deterministic, BN folded in eval mode)
# ----------------------------------------------------------------------------

_BN_EPS = 1e-5


def _fold_bn(w, b, gamma, beta, mean, var, w_dtype=jnp.float32):
    # w: (Cout, Cin) torch convention; returns (Cin, Cout) and (1, Cout)
    scale = gamma / jnp.sqrt(var + _BN_EPS)
    w_f = (w * scale[:, None]).T
    b_f = (b - mean) * scale + beta
    return w_f.astype(w_dtype), b_f[None, :].astype(jnp.float32)


def _init_conv_bn(key, cin, cout, w_dtype=jnp.float32):
    kw, kb = jax.random.split(key)
    w = 0.1 * jax.random.normal(kw, (cout, cin), jnp.float32)
    b = 0.1 * jax.random.normal(kb, (cout,), jnp.float32)
    gamma = jnp.ones((cout,), jnp.float32)
    beta = jnp.zeros((cout,), jnp.float32)
    mean = jnp.zeros((cout,), jnp.float32)
    var = jnp.ones((cout,), jnp.float32)
    return _fold_bn(w, b, gamma, beta, mean, var, w_dtype)


def _init_linear(key, cin, cout, bias=None, w_dtype=jnp.float32):
    kw, kb = jax.random.split(key)
    w = 0.1 * jax.random.normal(kw, (cout, cin), jnp.float32)
    if bias is None:
        bias = 0.1 * jax.random.normal(kb, (cout,), jnp.float32)
    return w.T.astype(w_dtype), bias[None, :].astype(jnp.float32)


def init_tnet_params(key, k):
    keys = jax.random.split(key, 6)
    eye_bias = jnp.eye(k, dtype=jnp.float32).reshape(-1)   # fc3.bias = eye(k).view(-1)
    return {
        "conv1": _init_conv_bn(keys[0], k, 64, jnp.float32),       # VPU path
        "conv2": _init_conv_bn(keys[1], 64, 128, jnp.bfloat16),    # MXU bf16
        "conv3": _init_conv_bn(keys[2], 128, 1024, jnp.bfloat16),
        "fc1": _init_conv_bn(keys[3], 1024, 512, jnp.bfloat16),
        "fc2": _init_conv_bn(keys[4], 512, 256, jnp.bfloat16),
        "fc3": _init_linear(keys[5], 256, k * k, bias=eye_bias, w_dtype=jnp.bfloat16),
    }


def init_pointnetfeat_params(key):
    keys = jax.random.split(key, 4)
    return {
        "tnet1": init_tnet_params(keys[0], 3),
        "conv1": _init_conv_bn(keys[1], 3, 64, jnp.float32),       # VPU path
        "conv2": _init_conv_bn(keys[2], 64, 128, jnp.bfloat16),
        "conv3": _init_conv_bn(keys[3], 128, 1024, jnp.bfloat16),
    }


# ----------------------------------------------------------------------------
# Forward passes
# ----------------------------------------------------------------------------

def tnet_forward(params, x_bnc, k):
    """x_bnc: (B, N, k) -> trans: (B, k, k)."""
    B = x_bnc.shape[0]
    g = fused_conv_chain(x_bnc, *params["conv1"], *params["conv2"],
                         *params["conv3"], relu3=True, emit_pointfeat=False)
    t = tnet_mlp(g, params, k * k)
    return t.reshape(B, k, k)


def pointnetfeat_forward(params, x_ncw, global_feat=True):
    """x_ncw: (B, 3, N) like the PyTorch module.  Returns (feat, trans, trans_feat)."""
    B, _, N = x_ncw.shape
    x_bnc = jnp.transpose(x_ncw, (0, 2, 1))                     # (B, N, 3)

    trans = tnet_forward(params["tnet1"], x_bnc, k=3)           # (B, 3, 3)

    # Fold the 3x3 input transform into conv1's weight:
    # (x @ trans) @ W1 == x @ (trans @ W1)  -> per-batch effective weight.
    w1, b1 = params["conv1"]                                    # w1: (3, 64)
    w1_eff = jnp.einsum("bij,jk->bik", trans, w1)               # (B, 3, 64)

    # TODO(synk): feature_transform=True branch (TNet(k=64)) not implemented
    # since the module default is feature_transform=False.
    trans_feat = None

    out = fused_conv_chain(x_bnc, w1_eff, b1, *params["conv2"], *params["conv3"],
                           relu3=False, emit_pointfeat=not global_feat)

    if global_feat:
        g = out                                                 # (B, 1024)
        return g, trans, trans_feat
    else:
        pointfeat, g = out                                      # (B,N,64), (B,1024)
        g_exp = jnp.broadcast_to(g[:, None, :], (B, N, 1024))
        cat = jnp.concatenate([g_exp, pointfeat], axis=-1)      # (B, N, 1088)
        return jnp.transpose(cat, (0, 2, 1)), trans, trans_feat # (B, 1088, N)


# ----------------------------------------------------------------------------
# Main
# ----------------------------------------------------------------------------

if __name__ == "__main__":
    key = jax.random.PRNGKey(0)
    k_param, k_data = jax.random.split(key)

    params = init_pointnetfeat_params(k_param)

    B, C, N = 2, 3, 16          # small: batch=2, xyz channels=3, 16 points
    x = jax.random.normal(k_data, (B, C, N), jnp.float32)

    # global_feat=True path
    feat, trans, trans_feat = pointnetfeat_forward(params, x, global_feat=True)
    jax.block_until_ready((feat, trans))
    assert feat.shape == (B, 1024), feat.shape
    assert trans.shape == (B, 3, 3), trans.shape
    assert trans_feat is None
    assert bool(jnp.all(jnp.isfinite(feat))) and bool(jnp.all(jnp.isfinite(trans)))

    # global_feat=False path (exercises the fused pointfeat output)
    feat2, trans2, _ = pointnetfeat_forward(params, x, global_feat=False)
    jax.block_until_ready((feat2, trans2))
    assert feat2.shape == (B, 1088, N), feat2.shape
    assert bool(jnp.all(jnp.isfinite(feat2)))

    print("KERNEL_OK")
</pallas_src>

<mosaic_0001>
module attributes {stable_mosaic.version = 11 : i64} {
  func.func @_fused_chain_kernel(%arg0: i32, %arg1: i32, %arg2: memref<1x16x3xf32, #tpu.memory_space<vmem>>, %arg3: memref<1x3x64xf32, #tpu.memory_space<vmem>>, %arg4: memref<1x64xf32, #tpu.memory_space<vmem>>, %arg5: memref<64x128xbf16, #tpu.memory_space<vmem>>, %arg6: memref<1x128xf32, #tpu.memory_space<vmem>>, %arg7: memref<128x1024xbf16, #tpu.memory_space<vmem>>, %arg8: memref<1x1024xf32, #tpu.memory_space<vmem>>, %arg9: memref<1x1x1024xf32, #tpu.memory_space<vmem>>, %arg10: memref<1x1024xf32, #tpu.memory_space<vmem>>) attributes {dimension_semantics = [#tpu.dimension_semantics<parallel>, #tpu.dimension_semantics<arbitrary>], iteration_bounds = array<i64: 2, 1>, scalar_prefetch = 0 : i64, scratch_operands = 1 : i64, tpu.core_type = #tpu.core_type<tc>, window_params = [{transform_indices = @transform_0, window_bounds = array<i64: 1, 16, 3>}, {pipeline_mode = #tpu.pipeline_mode<synchronous>, transform_indices = @transform_1, window_bounds = array<i64: 1, 3, 64>}, {pipeline_mode = #tpu.pipeline_mode<synchronous>, transform_indices = @transform_2, window_bounds = array<i64: 1, 64>}, {pipeline_mode = #tpu.pipeline_mode<synchronous>, transform_indices = @transform_3, window_bounds = array<i64: 64, 128>}, {pipeline_mode = #tpu.pipeline_mode<synchronous>, transform_indices = @transform_4, window_bounds = array<i64: 1, 128>}, {pipeline_mode = #tpu.pipeline_mode<synchronous>, transform_indices = @transform_5, window_bounds = array<i64: 128, 1024>}, {pipeline_mode = #tpu.pipeline_mode<synchronous>, transform_indices = @transform_6, window_bounds = array<i64: 1, 1024>}, {transform_indices = @transform_7, window_bounds = array<i64: 1, 1, 1024>}]} {
    %c0_i32 = arith.constant 0 : i32
    %0 = arith.cmpi eq, %arg1, %c0_i32 : i32
    %1 = arith.extui %0 : i1 to i32
    %c0_i32_0 = arith.constant 0 : i32
    %2 = arith.cmpi ne, %1, %c0_i32_0 : i32
    scf.if %2 {
      %cst_27 = arith.constant 0xFF800000 : f32
      %53 = vector.broadcast %cst_27 : f32 to vector<1x1024xf32>
      %c0_28 = arith.constant 0 : index
      %c0_29 = arith.constant 0 : index
      %54 = vector.load %arg10[%c0_28, %c0_29] : memref<1x1024xf32, #tpu.memory_space<vmem>>, vector<1x1024xf32>
      tpu.vector_store %arg10[%c0_28, %c0_29], %53 {strides = array<i32>} : memref<1x1024xf32, #tpu.memory_space<vmem>>, vector<1x1024xf32>,
    } else {
    }
    %c0 = arith.constant 0 : index
    %c0_1 = arith.constant 0 : index
    %c0_2 = arith.constant 0 : index
    %3 = vector.load %arg2[%c0, %c0_1, %c0_2] : memref<1x16x3xf32, #tpu.memory_space<vmem>>, vector<1x16x3xf32>
    %4 = vector.shape_cast %3 : vector<1x16x3xf32> to vector<16x3xf32>
    %c0_3 = arith.constant 0 : index
    %c0_4 = arith.constant 0 : index
    %c0_5 = arith.constant 0 : index
    %5 = vector.load %arg3[%c0_3, %c0_4, %c0_5] : memref<1x3x64xf32, #tpu.memory_space<vmem>>, vector<1x3x64xf32>
    %6 = vector.shape_cast %5 : vector<1x3x64xf32> to vector<3x64xf32>
    %7 = vector.extract_strided_slice %4 {offsets = [0, 0], sizes = [16, 1], strides = [1, 1]} : vector<16x3xf32> to vector<16x1xf32>
    %8 = vector.extract_strided_slice %6 {offsets = [0, 0], sizes = [1, 64], strides = [1, 1]} : vector<3x64xf32> to vector<1x64xf32>
    %9 = vector.broadcast %7 : vector<16x1xf32> to vector<16x64xf32>
    %10 = vector.broadcast %8 : vector<1x64xf32> to vector<16x64xf32>
    %11 = arith.mulf %9, %10 : vector<16x64xf32>
    %12 = vector.extract_strided_slice %4 {offsets = [0, 1], sizes = [16, 1], strides = [1, 1]} : vector<16x3xf32> to vector<16x1xf32>
    %13 = vector.extract_strided_slice %6 {offsets = [1, 0], sizes = [1, 64], strides = [1, 1]} : vector<3x64xf32> to vector<1x64xf32>
    %14 = vector.broadcast %12 : vector<16x1xf32> to vector<16x64xf32>
    %15 = vector.broadcast %13 : vector<1x64xf32> to vector<16x64xf32>
    %16 = arith.mulf %14, %15 : vector<16x64xf32>
    %17 = arith.addf %11, %16 : vector<16x64xf32>
    %18 = vector.extract_strided_slice %4 {offsets = [0, 2], sizes = [16, 1], strides = [1, 1]} : vector<16x3xf32> to vector<16x1xf32>
    %19 = vector.extract_strided_slice %6 {offsets = [2, 0], sizes = [1, 64], strides = [1, 1]} : vector<3x64xf32> to vector<1x64xf32>
    %20 = vector.broadcast %18 : vector<16x1xf32> to vector<16x64xf32>
    %21 = vector.broadcast %19 : vector<1x64xf32> to vector<16x64xf32>
    %22 = arith.mulf %20, %21 : vector<16x64xf32>
    %23 = arith.addf %17, %22 : vector<16x64xf32>
    %c0_6 = arith.constant 0 : index
    %c0_7 = arith.constant 0 : index
    %24 = vector.load %arg4[%c0_6, %c0_7] : memref<1x64xf32, #tpu.memory_space<vmem>>, vector<1x64xf32>
    %25 = vector.broadcast %24 : vector<1x64xf32> to vector<16x64xf32>
    %26 = arith.addf %23, %25 : vector<16x64xf32>
    %cst = arith.constant 0.000000e+00 : f32
    %27 = vector.broadcast %cst : f32 to vector<16x64xf32>
    %28 = arith.maximumf %26, %27 : vector<16x64xf32>
    %29 = arith.truncf %28 : vector<16x64xf32> to vector<16x64xbf16>
    %c0_8 = arith.constant 0 : index
    %c0_9 = arith.constant 0 : index
    %30 = vector.load %arg5[%c0_8, %c0_9] : memref<64x128xbf16, #tpu.memory_space<vmem>>, vector<64x128xbf16>
    %cst_10 = arith.constant dense<0.000000e+00> : vector<16x128xf32>
    %31 = tpu.matmul %29, %30, %cst_10 {dimension_numbers = #tpu.dot_dimension_numbers<[1], [0], [0], [1], [0, 0, 1, 1], [], []>} : vector<16x64xbf16>, vector<64x128xbf16>, vector<16x128xf32> -> vector<16x128xf32>
    %c0_11 = arith.constant 0 : index
    %c0_12 = arith.constant 0 : index
    %32 = vector.load %arg6[%c0_11, %c0_12] : memref<1x128xf32, #tpu.memory_space<vmem>>, vector<1x128xf32>
    %33 = vector.broadcast %32 : vector<1x128xf32> to vector<16x128xf32>
    %34 = arith.addf %31, %33 : vector<16x128xf32>
    %cst_13 = arith.constant 0.000000e+00 : f32
    %35 = vector.broadcast %cst_13 : f32 to vector<16x128xf32>
    %36 = arith.maximumf %34, %35 : vector<16x128xf32>
    %37 = arith.truncf %36 : vector<16x128xf32> to vector<16x128xbf16>
    %c0_14 = arith.constant 0 : index
    %c0_15 = arith.constant 0 : index
    %38 = vector.load %arg7[%c0_14, %c0_15] : memref<128x1024xbf16, #tpu.memory_space<vmem>>, vector<128x1024xbf16>
    %cst_16 = arith.constant dense<0.000000e+00> : vector<16x1024xf32>
    %39 = tpu.matmul %37, %38, %cst_16 {dimension_numbers = #tpu.dot_dimension_numbers<[1], [0], [0], [1], [0, 0, 1, 1], [], []>} : vector<16x128xbf16>, vector<128x1024xbf16>, vector<16x1024xf32> -> vector<16x1024xf32>
    %c0_17 = arith.constant 0 : index
    %c0_18 = arith.constant 0 : index
    %40 = vector.load %arg8[%c0_17, %c0_18] : memref<1x1024xf32, #tpu.memory_space<vmem>>, vector<1x1024xf32>
    %41 = vector.broadcast %40 : vector<1x1024xf32> to vector<16x1024xf32>
    %42 = arith.addf %39, %41 : vector<16x1024xf32>
    %cst_19 = arith.constant 0.000000e+00 : f32
    %43 = vector.broadcast %cst_19 : f32 to vector<16x1024xf32>
    %44 = arith.maximumf %42, %43 : vector<16x1024xf32>
    %c0_20 = arith.constant 0 : index
    %c0_21 = arith.constant 0 : index
    %45 = vector.load %arg10[%c0_20, %c0_21] : memref<1x1024xf32, #tpu.memory_space<vmem>>, vector<1x1024xf32>
    %cst_22 = arith.constant dense<0xFF800000> : vector<1024xf32>
    %46 = vector.multi_reduction <maximumf>, %44, %cst_22 [0] : vector<16x1024xf32> to vector<1024xf32>
    %47 = vector.shape_cast %46 : vector<1024xf32> to vector<1x1024xf32>
    %48 = arith.maximumf %45, %47 : vector<1x1024xf32>
    %c0_23 = arith.constant 0 : index
    %c0_24 = arith.constant 0 : index
    %49 = vector.load %arg10[%c0_23, %c0_24] : memref<1x1024xf32, #tpu.memory_space<vmem>>, vector<1x1024xf32>
    tpu.vector_store %arg10[%c0_23, %c0_24], %48 {strides = array<i32>} : memref<1x1024xf32, #tpu.memory_space<vmem>>, vector<1x1024xf32>,
    %c0_i32_25 = arith.constant 0 : i32
    %50 = arith.cmpi eq, %arg1, %c0_i32_25 : i32
    %51 = arith.extui %50 : i1 to i32
    %c0_i32_26 = arith.constant 0 : i32
    %52 = arith.cmpi ne, %51, %c0_i32_26 : i32
    scf.if %52 {
      %c0_27 = arith.constant 0 : index
      %c0_28 = arith.constant 0 : index
      %53 = vector.load %arg10[%c0_27, %c0_28] : memref<1x1024xf32, #tpu.memory_space<vmem>>, vector<1x1024xf32>
      %c0_29 = arith.constant 0 : index
      %c0_30 = arith.constant 0 : index
      %c0_31 = arith.constant 0 : index
      %54 = vector.load %arg9[%c0_29, %c0_30, %c0_31] : memref<1x1x1024xf32, #tpu.memory_space<vmem>>, vector<1x1x1024xf32>
      %55 = vector.shape_cast %54 : vector<1x1x1024xf32> to vector<1x1024xf32>
      %56 = vector.shape_cast %53 : vector<1x1024xf32> to vector<1x1x1024xf32>
      tpu.vector_store %arg9[%c0_29, %c0_30, %c0_31], %56 {strides = array<i32>} : memref<1x1x1024xf32, #tpu.memory_space<vmem>>, vector<1x1x1024xf32>,
    } else {
    }
    return
  }
  func.func @transform_0(%arg0: i32, %arg1: i32) -> (i32, i32, i32) {
    %c0_i32 = arith.constant 0 : i32
    %c0_i32_0 = arith.constant 0 : i32
    return %arg0, %arg1, %c0_i32 : i32, i32, i32
  }
  func.func @transform_1(%arg0: i32, %arg1: i32) -> (i32, i32, i32) {
    %c0_i32 = arith.constant 0 : i32
    %c0_i32_0 = arith.constant 0 : i32
    %c0_i32_1 = arith.constant 0 : i32
    %c0_i32_2 = arith.constant 0 : i32
    return %c0_i32, %c0_i32_0, %c0_i32_1 : i32, i32, i32
  }
  func.func @transform_2(%arg0: i32, %arg1: i32) -> (i32, i32) {
    %c0_i32 = arith.constant 0 : i32
    %c0_i32_0 = arith.constant 0 : i32
    %c0_i32_1 = arith.constant 0 : i32
    return %c0_i32, %c0_i32_0 : i32, i32
  }
  func.func @transform_3(%arg0: i32, %arg1: i32) -> (i32, i32) {
    %c0_i32 = arith.constant 0 : i32
    %c0_i32_0 = arith.constant 0 : i32
    %c0_i32_1 = arith.constant 0 : i32
    return %c0_i32, %c0_i32_0 : i32, i32
  }
  func.func @transform_4(%arg0: i32, %arg1: i32) -> (i32, i32) {
    %c0_i32 = arith.constant 0 : i32
    %c0_i32_0 = arith.constant 0 : i32
    %c0_i32_1 = arith.constant 0 : i32
    return %c0_i32, %c0_i32_0 : i32, i32
  }
  func.func @transform_5(%arg0: i32, %arg1: i32) -> (i32, i32) {
    %c0_i32 = arith.constant 0 : i32
    %c0_i32_0 = arith.constant 0 : i32
    %c0_i32_1 = arith.constant 0 : i32
    return %c0_i32, %c0_i32_0 : i32, i32
  }
  func.func @transform_6(%arg0: i32, %arg1: i32) -> (i32, i32) {
    %c0_i32 = arith.constant 0 : i32
    %c0_i32_0 = arith.constant 0 : i32
    %c0_i32_1 = arith.constant 0 : i32
    return %c0_i32, %c0_i32_0 : i32, i32
  }
  func.func @transform_7(%arg0: i32, %arg1: i32) -> (i32, i32, i32) {
    %c0_i32 = arith.constant 0 : i32
    %c0_i32_0 = arith.constant 0 : i32
    %c0_i32_1 = arith.constant 0 : i32
    return %arg0, %c0_i32, %c0_i32_0 : i32, i32, i32
  }
}

</mosaic_0001>

<bundles_post_ra>
// kernel: tpu_custom_call.1
= control target key start
LH: loop header
LB: loop body
LE: loop exit
PB: predicated region body
PF: predicated region fallthrough
CT: control target
= control target key end

     0   :  { %12 = vsyncpa [#allocation4], 0  ;;  %s1846_s0 = inlined_call_operand.vmem [shape: f32[2,16,3], index: 0, kind: input, shape index: {}]   ;;  %s1847_s1 = inlined_call_operand.vmem [shape: f32[1,3,64], index: 1, kind: input, shape index: {}]   ;;  %s1848_s2 = inlined_call_operand.vmem [shape: f32[1,64], index: 2, kind: input, shape index: {}]   ;;  %s1849_s3 = inlined_call_operand.vmem [shape: bf16[64,128], index: 3, kind: input, shape index: {}]   ;;  %s1850_s4 = inlined_call_operand.vmem [shape: f32[1,128], index: 4, kind: input, shape index: {}]   ;;  %s1851_s5 = inlined_call_operand.hbm [shape: bf16[128,1024], index: 5, kind: input, shape index: {}]   ;;  %s1852_s6 = inlined_call_operand.vmem [shape: f32[1,1024], index: 6, kind: input, shape index: {}]   ;;  %s1853_s7 = inlined_call_operand.hbm [shape: f32[2,1,1024], index: 7, kind: output, shape index: {}]  }
   0x1   :  { %13 = vsyncpa [#allocation5], 0 }
   0x2   :  { %15 = vsyncpa [#allocation5 + $0x1], 0  ;;  %s1657_s24 = smov 0   ;;  %s1659_s25 = smov 0  }
   0x3   :  { %s1661_s26 = smov 0   ;;  %s1663_s27 = smov 0  }
   0x4   :  { %s1665_s28 = smov 0   ;;  %s1667_s29 = smov 0  }
   0x5 LB: > { %s1312_s30 = sadd.s32 4294967295, %s1605_s29   ;;  %s1313_s8 = sadd.s32 4294967294, %s1605_s29   ;;  %s1605_s29 = sphi %s1667_s29, %s21_s29   ;;  %s1601_s28 = sphi %s1665_s28, %s1862_s28   ;;  %s1597_s27 = sphi %s1663_s27, %s1861_s27   ;;  %s1593_s26 = sphi %s1661_s26, %s1860_s26   ;;  %s1589_s25 = sphi %s1659_s25, %s1859_s25   ;;  %s1585_s24 = sphi %s1657_s24, %s1858_s24  }
   0x6   : > { %s33_s9 = sadd.s32 1, %s1601_s28  ;;  %s194_s10 = sadd.s32 1, %s1593_s26 }
   0x7   : > { %p35_p0 = scmp.ge.s32.totalorder %s33_s9, 2  ;;  %p204_p1 = scmp.ne.s32.totalorder %s1593_s26, %s1589_s25 }
   0x8   : > { %p205_p2 = scmp.eq.s32.totalorder %s1312_s30, 1  ;;  %p210_p3 = scmp.ne.s32.totalorder %s1589_s25, %s1585_s24 }
   0x9   : > { %s1864_s9 = smov (%p35_p0, %s33_s9), 0  ;;  %p211_p5 = scmp.eq.s32.totalorder %s1313_s8, 1 }
   0xa   : > { %p1697_p4 = por %p205_p2, %p204_p1  ;;  %s191_s12 = ssub.s32 %s1601_s28, %s1864_s9 }
   0xb   : > { %p1314_p6 = scmp.ge.s32.totalorder %s1605_s29, 1  ;;  %p192_p7 = scmp.eq.s32.totalorder %s191_s12, 0 }
   0xc   : > { %p1704_p8 = por %p211_p5, %p210_p3  ;;  %p218_p9 = scmp.lt.s32.totalorder %s1605_s29, 3 }
   0xd   : > { %s1710_s14 = scalar_select %p192_p7, %s1593_s26, %s194_s10  }
   0xe   : > { %p1712_p10 = pnand %p1314_p6, %p218_p9  ;;  %p1716_p11 = scmp.eq.s32.totalorder %s1312_s30, 0 }
   0xf   : > { %s1607_s17 = smov [#allocation3]  }
  0x10   : > { %p1423_p12 = pneg %p1712_p10  ;;  %s242_s18 = sshll.u32 %s1607_s17, 4  ;;  %s243_s18 = int_to_ptr.vmem [resolvable:$true] %s242_s18 }
  0x11   : > { %s1510_s19 = scalar_lea.vmem %s243_s18, 8192  ;;  %p1518_p5 = scmp.lt.s32.totalorder %s243_s18, %s243_s18 }
  0x12   : > { %p1424_p13 = pnand %p1716_p11, %p1423_p12  ;;  %p1511_p1 = scmp.ne.s32.totalorder %s243_s18, %s1510_s19 }
  0x13   : > { %p1519_p6 = scmp.lt.s32.totalorder %s1510_s19, %s1510_s19 }
  0x14   : > { %p1501_p0 = pneg %p1424_p13 }
  0x15   : > { %p1520_p7 = por %p1519_p6, %p1518_p5 }
  0x16   : > { %p1513_p2 = pnand %p1511_p1, %p1501_p0 }
  0x18   : > { %p1514_p3 = pneg %p1513_p2 }
  0x1a   : > { %p1521_p9 = pnand %p1520_p7, %p1514_p3 }
  0x1c   : > { %1524 = shalt.err (!%p1521_p9)
}
  0x1d   : > { %s1608_s20 = smov 512   ;;  %s1609_s21 = smov 32  }
  0x1e   : > { %1426 = dma.hbm_to_vmem [thread:$0]  (!%p1424_p13), %s1851_s5, 8192, %s243_s18, [#allocation4], %s1608_s20, %s1608_s20, %s1609_s21  }
  0x1f   : > { %274 = sbr.rel (%p1712_p10) target bundleno = 662 (0x296), region = 48 }
  0x24   : > { %1576 = dma.done.wait (%p1716_p11), [#allocation4], 8192  }
  0x25   : > { %1578 = vsyncadd (%p1716_p11), [#allocation4], 4294959104  ;;  %p311_p12 = scmp.lt.s32.totalorder %s1597_s27, 1  ;;  %v1610_v0 = vmov 1   ;;  %v1611_v1 = vmov 0   ;;  %v1612_v3 = vmov 0.0   ;;  %v339_v38 = vlaneseq }
  0x26   : > { %1492 = vset.pattern.permute.xlu1 %v1610_v0  ;;  %1491 = vset.pattern.permute.xlu0 %v1611_v1  ;;  %v1495_v4 = vld [vmem:[%s1849_s3 + $0x18] sm:$0xff]   ;;  %v1496_v6 = vld [vmem:[%s1849_s3 + $0x10] sm:$0xff]   ;;  %v1497_v7 = vld [vmem:[%s1849_s3 + $0x8] sm:$0xff]   ;;  %v1613_v8 = vmov 2   ;;  %vm1614_vm0 = vmmov 0   ;;  %vm428_vm1 = vcmask 523264  }
  0x27   : > { %s312_s30 = scalar_select %p311_p12, %s1597_s27, 1  ;;  %934 = vmatprep.mubr.bf16.mxu1 %v1611_v1  ;;  %1405 = vmatprep.subr.bf16.mxu0 %v1612_v3  ;;  %v1498_v9 = vld [vmem:[%s1849_s3] sm:$0xff]   ;;  %v1752_v12 = vld [vmem:[#allocation3 + $0x1c8] sm:$0xff]  ;;  %v1760_v39 = vshrl.u32 %v339_v38, 7 }
  0x28   : > { %1406 = vmatpush3.bf16.msra.mxu0 %v1495_v4  ;;  %1413 = vmatprep.mubr.msk.bf16.mxu0 %vm1614_vm0, %v1612_v3  ;;  %v532_v10 = vld [vmem:[#allocation3 + $0x1c0] sm:$0xff]  ;;  %v1754_v14 = vld [vmem:[#allocation3 + $0x1e8] sm:$0xff]  ;;  %s307_s19 = sand.u32 1, %s1589_s25   ;;  %s1399_s21 = sshll.u32 %s1597_s27, 7 }
  0x29   : > { %s1398_s8 = sshll.u32 %s312_s30, 4  ;;  %1407 = vmatprep.subr.bf16.mxu0 %v1612_v3  ;;  %v536_v11 = vld [vmem:[#allocation3 + $0x1e0] sm:$0xff]  ;;  %v1387_v18 = vcombine.low %v1752_v12, %v1754_v14  ;;  %v1388_v19 = vcombine.high %v1752_v12, %v1754_v14  ;;  %v355_v40 = vsub.s32 1, %v1760_v39  ;;  %v341_v41 = vsub.s32 0, %v1760_v39  ;;  %v529_v4 = vld [vmem:[#allocation3 + $0x1a8] sm:$0xff]  ;;  %s1319_s20 = sshll.u32 %s307_s19, 3 }
  0x2a   : > { %s318_s15 = scalar_lea.vmem %s1846_s0, %s1398_s8  ;;  %v1386_v13 = vcombine.high %v532_v10, %v536_v11  ;;  %v1385_v15 = vcombine.low %v532_v10, %v536_v11  ;;  %v524_v16 = vld [vmem:[#allocation3 + $0x180] sm:$0xff]  ;;  %v371_v45 = vsub.s32 2, %v1760_v39  ;;  %v521_v10 = vld [vmem:[#allocation3 + $0x168] sm:$0xff]  ;;  %s309_s22 = scalar_lea.vmem [#allocation6], %s1319_s20 }
  0x2b   : > { %v326_v2 = vld [vmem:[%s318_s15] sm:$0xff]  ;;  %v327_v5 = vld [vmem:[%s318_s15 + $0x8] sm:$0xff]  ;;  %s1227_s23 = sshll.u32 %s309_s22, 4  ;;  %s1225_s10 = scalar_lea.hbm %s1853_s7, %s1399_s21  ;;  %s1228_s23 = int_to_ptr.vmem [resolvable:$true] %s1227_s23 }
  0x2c   : > { %346 = vperm.xlu1 %1492, %v326_v2   ;;  %331 = vperm.xlu0 %1491, %v326_v2   ;;  %v528_v17 = vld [vmem:[#allocation3 + $0x1a0] sm:$0xff]  ;;  %v497_v12 = vld [vmem:[#allocation3 + $0xa8] sm:$0xff]  ;;  %s1213_s12 = scalar_lea.sflag [#allocation5], %s307_s19  ;;  %s1525_s15 = scalar_lea.vmem %s1228_s23, 128 }
  0x2d   : > { %1408 = vmatpush3.bf16.msra.mxu0 %v1496_v6  ;;  %v1378_v20 = vcombine.high %v524_v16, %v528_v17  ;;  %902 = vmatprep.subr.bf16.mxu1 %v1386_v13  ;;  %v1377_v21 = vcombine.low %v524_v16, %v528_v17  ;;  %v516_v22 = vld [vmem:[#allocation3 + $0x140] sm:$0xff]  ;;  %v513_v16 = vld [vmem:[#allocation3 + $0x128] sm:$0xff]  ;;  %p1526_p10 = scmp.ne.s32.totalorder %s1228_s23, %s1525_s15  ;;  %s1616_s16 = smov [#allocation6]  }
  0x2e   : > { %1409 = vmatprep.subr.bf16.mxu0 %v1612_v3  ;;  %903 = vmatpush1.bf16.msra.mxu1 %v1385_v15  ;;  %v520_v23 = vld [vmem:[#allocation3 + $0x160] sm:$0xff]  ;;  %v509_v15 = vld [vmem:[#allocation3 + $0x108] sm:$0xff]  ;;  %s1529_s17 = sshll.u32 %s1616_s16, 4  ;;  %s1530_s17 = int_to_ptr.vmem [resolvable:$false] %s1529_s17 }
  0x2f   : > { %904 = vmatprep.subr.bf16.mxu1 %v1378_v20  ;;  %v1370_v24 = vcombine.high %v516_v22, %v520_v23  ;;  %v1369_v25 = vcombine.low %v516_v22, %v520_v23  ;;  %v508_v26 = vld [vmem:[#allocation3 + $0x100] sm:$0xff]  ;;  %v501_v20 = vld [vmem:[#allocation3 + $0xc8] sm:$0xff]  ;;  %v1363_v22 = vcombine.low %v509_v15, %v513_v16  ;;  %p1527_p11 = pnand %p1526_p10, %p1697_p4  ;;  %s1531_s27 = scalar_lea.vmem %s1530_s17, 256 }
  0x30   : > { %350 = vperm.xlu1 %1492, %v327_v5   ;;  %336 = vperm.xlu0 %1491, %v327_v5   ;;  %v512_v27 = vld [vmem:[#allocation3 + $0x120] sm:$0xff]  ;;  %v481_v38 = vld [vmem:[#allocation3 + $0x28] sm:$0xff]  ;;  %p1532_p0 = scmp.lt.s32.totalorder %s1228_s23, %s1530_s17  ;;  %p1533_p1 = scmp.lt.s32.totalorder %s1531_s27, %s1525_s15 }
  0x31   : > { %1410 = vmatpush3.bf16.msra.mxu0 %v1497_v7  ;;  %v1362_v28 = vcombine.high %v508_v26, %v512_v27  ;;  %v1361_v29 = vcombine.low %v508_v26, %v512_v27  ;;  %v500_v30 = vld [vmem:[#allocation3 + $0xc0] sm:$0xff]  ;;  %p1528_p13 = pneg %p1527_p11 }
  0x32   : > { %1411 = vmatprep.subr.bf16.mxu0 %v1612_v3  ;;  %905 = vmatpush1.bf16.msra.mxu1 %v1377_v21  ;;  %v504_v31 = vld [vmem:[#allocation3 + $0xe0] sm:$0xff]  ;;  %v525_v3 = vld [vmem:[#allocation3 + $0x188] sm:$0xff]  ;;  %p1534_p2 = por %p1533_p1, %p1532_p0 }
  0x33   : > { %906 = vmatprep.subr.bf16.mxu1 %v1370_v24  ;;  %v1354_v32 = vcombine.high %v500_v30, %v504_v31  ;;  %v1353_v33 = vcombine.low %v500_v30, %v504_v31  ;;  %v492_v34 = vld [vmem:[#allocation3 + $0x80] sm:$0xff]  ;;  %v1379_v11 = vcombine.low %v525_v3, %v529_v4  ;;  %v505_v21 = vld [vmem:[#allocation3 + $0xe8] sm:$0xff] }
  0x34   : > { %1494 = vset.pattern.permute.xlu1 %v1613_v8  ;;  %1493 = vset.pattern.permute.xlu0 %v1613_v8  ;;  %v496_v35 = vld [vmem:[#allocation3 + $0xa0] sm:$0xff]  ;;  %v1380_v8 = vcombine.high %v525_v3, %v529_v4  ;;  %v1356_v23 = vcombine.high %v501_v20, %v505_v21  ;;  %v493_v24 = vld [vmem:[#allocation3 + $0x88] sm:$0xff]  ;;  %v1355_v14 = vcombine.low %v501_v20, %v505_v21  ;;  %v511_v20 = vld [vmem:[#allocation3 + $0x118] sm:$0xff]  ;;  %p1535_p3 = pnand %p1534_p2, %p1528_p13 }
  0x35   : > { %366 = vperm.xlu1 %1494, %v327_v5   ;;  %362 = vperm.xlu0 %1493, %v326_v2   ;;  %v1346_v36 = vcombine.high %v492_v34, %v496_v35  ;;  %v1345_v37 = vcombine.low %v492_v34, %v496_v35  ;;  %v328_v42 = vld [vmem:[%s1847_s1] sm:$0x7]  ;;  %v489_v30 = vld [vmem:[#allocation3 + $0x68] sm:$0xff]  ;;  %v515_v21 = vld [vmem:[#allocation3 + $0x138] sm:$0xff] }
  0x36   : > { %1412 = vmatpush3.bf16.msra.mxu0 %v1498_v9  ;;  %907 = vmatpush1.bf16.msra.mxu1 %v1369_v25  ;;  %v356_v46 = vrot.slane %v328_v42, %v355_v40  ;;  %v342_v47 = vrot.slane %v328_v42, %v341_v41  ;;  %v372_v50 = vrot.slane %v328_v42, %v371_v45  ;;  %v1322_v61 = vld [vmem:[%s1848_s2] ss:$0 sm:$0xff]  ;;  %v517_v9 = vld [vmem:[#allocation3 + $0x148] sm:$0xff] }
  0x37   : > { %945 = vmatprep.subr.bf16.mxu0 %v1388_v19  ;;  %908 = vmatprep.subr.bf16.mxu1 %v1362_v28  ;;  %v1372_v13 = vcombine.high %v517_v9, %v521_v10  ;;  %v1371_v17 = vcombine.low %v517_v9, %v521_v10  ;;  %v1364_v19 = vcombine.high %v509_v15, %v513_v16  ;;  %v484_v26 = vld [vmem:[#allocation3 + $0x40] sm:$0xff]  ;;  %v485_v28 = vld [vmem:[#allocation3 + $0x48] sm:$0xff]  ;;  %v519_v9 = vld [vmem:[#allocation3 + $0x158] sm:$0xff] }
  0x38   : > { %v1347_v25 = vcombine.low %v493_v24, %v497_v12  ;;  %v488_v27 = vld [vmem:[#allocation3 + $0x60] sm:$0xff]  ;;  %v1339_v31 = vcombine.low %v485_v28, %v489_v30  ;;  %v523_v10 = vld [vmem:[#allocation3 + $0x178] sm:$0xff] }
  0x39   : > { %v476_v34 = vld [vmem:[#allocation3] sm:$0xff]  ;;  %v1376_v16 = vcombine.high %v519_v9, %v523_v10 }
  0x3a   : > { %909 = vmatpush1.bf16.msra.mxu1 %v1361_v29  ;;  %v1338_v29 = vcombine.high %v484_v26, %v488_v27  ;;  %v480_v35 = vld [vmem:[#allocation3 + $0x20] sm:$0xff] }
  0x3b   : > { %910 = vmatprep.subr.bf16.mxu1 %v1354_v32  ;;  %v1340_v32 = vcombine.high %v485_v28, %v489_v30  ;;  %v1367_v28 = vcombine.low %v511_v20, %v515_v21  ;;  %v494_v30 = vld [vmem:[#allocation3 + $0x90] sm:$0xff] }
  0x3e   : > { %911 = vmatpush1.bf16.msra.mxu1 %v1353_v33  ;;  %v1337_v33 = vcombine.low %v484_v26, %v488_v27  ;;  %v507_v26 = vld [vmem:[#allocation3 + $0xf8] sm:$0xff] }
  0x3f   : > { %912 = vmatprep.subr.bf16.mxu1 %v1346_v36  ;;  %v477_v36 = vld [vmem:[#allocation3 + $0x8] sm:$0xff] }
  0x40   : > { %v1331_v42 = vcombine.low %v477_v36, %v481_v38 }
  0x42   : > { %913 = vmatpush1.bf16.msra.mxu1 %v1345_v37  ;;  %v1330_v37 = vcombine.high %v476_v34, %v480_v35 }
  0x43   : > { %914 = vmatprep.subr.bf16.mxu1 %v1338_v29 }
  0x46   : > { %915 = vmatpush1.bf16.msra.mxu1 %v1337_v33  ;;  %v499_v33 = vld [vmem:[#allocation3 + $0xb8] sm:$0xff] }
  0x47   : > { %916 = vmatprep.subr.bf16.mxu1 %v1330_v37 }
  0xa7   : > { %v347_v43 = vpop.permute.xlu1 %346  ;;  %v332_v44 = vpop.permute.xlu0 %331 }
  0xa8   : > { %v357_v51 = vmul.f32 %v356_v46, %v347_v43  ;;  %v343_v52 = vmul.f32 %v342_v47, %v332_v44  ;;  %v1332_v43 = vcombine.high %v477_v36, %v481_v38  ;;  %v1329_v44 = vcombine.low %v476_v34, %v480_v35  ;;  %v486_v38 = vld [vmem:[#allocation3 + $0x50] sm:$0xff] }
  0xaa   : > { %v359_v57 = vadd.f32 %v357_v51, %v343_v52  ;;  %917 = vmatpush1.bf16.msra.mxu1 %v1329_v44  ;;  %v491_v44 = vld [vmem:[#allocation3 + $0x78] sm:$0xff] }
  0xab   : > { %v351_v48 = vpop.permute.xlu1 %350  ;;  %v337_v49 = vpop.permute.xlu0 %336 }
  0xac   : > { %v358_v53 = vmul.f32 %v356_v46, %v351_v48  ;;  %v344_v54 = vmul.f32 %v342_v47, %v337_v49  ;;  %v534_v46 = vld [vmem:[#allocation3 + $0x1d0] sm:$0xff]  ;;  %v535_v48 = vld [vmem:[#allocation3 + $0x1d8] sm:$0xff] }
  0xad   : > { %v538_v47 = vld [vmem:[#allocation3 + $0x1f0] sm:$0xff] }
  0xae   : > { %v360_v58 = vadd.f32 %v358_v53, %v344_v54  ;;  %v1390_v49 = vcombine.high %v534_v46, %v538_v47  ;;  %v1389_v51 = vcombine.low %v534_v46, %v538_v47  ;;  %v1323_v54 = vld [vmem:[%s1850_s4] ss:$0 sm:$0xff] }
  0xb0   : > { %v367_v55 = vpop.permute.xlu1 %366  ;;  %v363_v56 = vpop.permute.xlu0 %362  ;;  %988 = vmatprep.subr.bf16.mxu1 %v1390_v49 }
  0xb1   : > { %v374_v59 = vmul.f32 %v372_v50, %v367_v55  ;;  %v373_v60 = vmul.f32 %v372_v50, %v363_v56  ;;  %v539_v50 = vld [vmem:[#allocation3 + $0x1f8] sm:$0xff] }
  0xb2   : > { %v1391_v52 = vcombine.low %v535_v48, %v539_v50  ;;  %v1392_v53 = vcombine.high %v535_v48, %v539_v50  ;;  %v478_v50 = vld [vmem:[#allocation3 + $0x10] sm:$0xff] }
  0xb3   : > { %v376_v62 = vadd.f32 %v374_v59, %v360_v58  ;;  %v375_v63 = vadd.f32 %v373_v60, %v359_v57  ;;  %v526_v60 = vld [vmem:[#allocation3 + $0x190] sm:$0xff] }
  0xb5   : > { %v385_v0 = vadd.f32 %v1322_v61, %v376_v62  ;;  %v384_v2 = vadd.f32 %v1322_v61, %v375_v63  ;;  %v530_v62 = vld [vmem:[#allocation3 + $0x1b0] sm:$0xff]  ;;  %v527_v63 = vld [vmem:[#allocation3 + $0x198] sm:$0xff] }
  0xb7   : > { %v387_v5 = vmax.f32 %v385_v0, 0.0  ;;  %v386_v6 = vmax.f32 %v384_v2, 0.0  ;;  %v531_v0 = vld [vmem:[#allocation3 + $0x1b8] sm:$0xff] }
  0xb9   : > { %v388_v7 = vpack.c.bf16 %v387_v5, %v386_v6  ;;  %v1382_v5 = vcombine.high %v526_v60, %v530_v62  ;;  %v1384_v6 = vcombine.high %v527_v63, %v531_v0 }
  0xbb   : > { %1414 = vmatmul.mubr.msk.bf16.vlgmr.msra.gmra.mxu0 %vm428_vm1, %v388_v7  ;;  %v518_v7 = vld [vmem:[#allocation3 + $0x150] sm:$0xff] }
  0xbc   : > { %946 = vmatpush1.bf16.msra.mxu0 %v1387_v18  ;;  %977 = vmatprep.mubr.bf16.mxu0 %v1611_v1  ;;  %v1348_v18 = vcombine.high %v493_v24, %v497_v12  ;;  %v1368_v12 = vcombine.high %v511_v20, %v515_v21 }
  0xbd   : > { %947 = vmatprep.subr.bf16.mxu0 %v1380_v8  ;;  %v522_v8 = vld [vmem:[#allocation3 + $0x170] sm:$0xff] }
  0xbe   : > { %v1374_v15 = vcombine.high %v518_v7, %v522_v8 }
  0xc0   : > { %948 = vmatpush1.bf16.msra.mxu0 %v1379_v11  ;;  %v1381_v11 = vcombine.low %v526_v60, %v530_v62 }
  0xc1   : > { %949 = vmatprep.subr.bf16.mxu0 %v1372_v13  ;;  %v1383_v13 = vcombine.low %v527_v63, %v531_v0 }
  0xc4   : > { %950 = vmatpush1.bf16.msra.mxu0 %v1371_v17  ;;  %v510_v17 = vld [vmem:[#allocation3 + $0x110] sm:$0xff] }
  0xc5   : > { %951 = vmatprep.subr.bf16.mxu0 %v1364_v19  ;;  %v514_v19 = vld [vmem:[#allocation3 + $0x130] sm:$0xff] }
  0xc6   : > { %v1366_v24 = vcombine.high %v510_v17, %v514_v19  ;;  %v1365_v27 = vcombine.low %v510_v17, %v514_v19 }
  0xc8   : > { %952 = vmatpush1.bf16.msra.mxu0 %v1363_v22  ;;  %v1373_v22 = vcombine.low %v518_v7, %v522_v8 }
  0xc9   : > { %953 = vmatprep.subr.bf16.mxu0 %v1356_v23  ;;  %v1375_v23 = vcombine.low %v519_v9, %v523_v10 }
  0xcc   : > { %954 = vmatpush1.bf16.msra.mxu0 %v1355_v14  ;;  %v502_v14 = vld [vmem:[#allocation3 + $0xd0] sm:$0xff] }
  0xcd   : > { %955 = vmatprep.subr.bf16.mxu0 %v1348_v18  ;;  %v506_v18 = vld [vmem:[#allocation3 + $0xf0] sm:$0xff] }
  0xce   : > { %v1358_v29 = vcombine.high %v502_v14, %v506_v18  ;;  %v1357_v34 = vcombine.low %v502_v14, %v506_v18 }
  0xd0   : > { %956 = vmatpush1.bf16.msra.mxu0 %v1347_v25  ;;  %v503_v25 = vld [vmem:[#allocation3 + $0xd8] sm:$0xff] }
  0xd1   : > { %957 = vmatprep.subr.bf16.mxu0 %v1340_v32  ;;  %v495_v32 = vld [vmem:[#allocation3 + $0x98] sm:$0xff]  ;;  %v1359_v35 = vcombine.low %v503_v25, %v507_v26 }
  0xd2   : > { %v1352_v37 = vcombine.high %v495_v32, %v499_v33  ;;  %v1351_v47 = vcombine.low %v495_v32, %v499_v33  ;;  %v564_v33 = vsub.s32 5, %v1760_v39 }
  0xd4   : > { %958 = vmatpush1.bf16.msra.mxu0 %v1339_v31  ;;  %v498_v31 = vld [vmem:[#allocation3 + $0xb0] sm:$0xff] }
  0xd5   : > { %959 = vmatprep.subr.bf16.mxu0 %v1332_v43  ;;  %v1350_v36 = vcombine.high %v494_v30, %v498_v31  ;;  %v487_v43 = vld [vmem:[#allocation3 + $0x58] sm:$0xff]  ;;  %v1349_v46 = vcombine.low %v494_v30, %v498_v31  ;;  %v568_v30 = vsub.s32 6, %v1760_v39 }
  0xd6   : > { %v1344_v49 = vcombine.high %v487_v43, %v491_v44 }
  0xd8   : > { %960 = vmatpush1.bf16.msra.mxu0 %v1331_v42  ;;  %v490_v42 = vld [vmem:[#allocation3 + $0x70] sm:$0xff] }
  0xd9   : > { %1031 = vmatprep.subr.bf16.mxu0 %v1392_v53  ;;  %v1342_v48 = vcombine.high %v486_v38, %v490_v42  ;;  %v483_v53 = vld [vmem:[#allocation3 + $0x38] sm:$0xff] }
 0x17b   : > { %v466_v55 = vpop.f32.mrf.mxu0 }
 0x17c   : > { %v467_v57 = vadd.f32 %v1323_v54, %v466_v55  ;;  %v1343_v55 = vcombine.low %v487_v43, %v491_v44 }
 0x17d   : > { %v1415_v56 = vpop.f32.mrf.mxu0 }
 0x17e   : > { %v473_v2 = vmax.f32 %v467_v57, 0.0 }
 0x17f   : > { %v469_v58 = vpop.f32.mrf.mxu0 }
 0x180   : > { %v470_v59 = vadd.f32 %v1323_v54, %v469_v58  ;;  %v1341_v54 = vcombine.low %v486_v38, %v490_v42 }
 0x181   : > { %v1416_v61 = vpop.f32.mrf.mxu0 }
 0x182   : > { %v474_v3 = vmax.f32 %v470_v59, 0.0 }
 0x184   : > { %v1784_v4 = vpack.c.bf16 %v474_v3, %v473_v2  ;;  %v556_v3 = vsub.s32 3, %v1760_v39 }
 0x186   : > { %935 = vmatmul.mubr.bf16.vlgmr.msra.gmra.mxu1 %v1784_v4  ;;  %978 = vmatmul.mubr.bf16.vlgmr.msra.gmra.mxu0 %v1784_v4 }
 0x187   : > { %989 = vmatpush1.bf16.msra.mxu1 %v1389_v51  ;;  %1032 = vmatpush1.bf16.msra.mxu0 %v1391_v52  ;;  %v482_v51 = vld [vmem:[#allocation3 + $0x30] sm:$0xff]  ;;  %v479_v52 = vld [vmem:[#allocation3 + $0x18] sm:$0xff] }
 0x188   : > { %990 = vmatprep.subr.bf16.mxu1 %v1382_v5  ;;  %1033 = vmatprep.subr.bf16.mxu0 %v1384_v6  ;;  %v1334_v56 = vcombine.high %v478_v50, %v482_v51  ;;  %v1336_v57 = vcombine.high %v479_v52, %v483_v53  ;;  %v1333_v58 = vcombine.low %v478_v50, %v482_v51  ;;  %v540_v5 = vld [vmem:[%s1852_s6] sm:$0xff] }
 0x189   : > { %1020 = vmatprep.mubr.bf16.mxu1 %v1611_v1  ;;  %1063 = vmatprep.mubr.bf16.mxu0 %v1611_v1  ;;  %v1360_v1 = vcombine.high %v503_v25, %v507_v26  ;;  %v1335_v59 = vcombine.low %v479_v52, %v483_v53  ;;  %v549_v8 = vrot.slane %v540_v5, %v355_v40 }
 0x18a   : > { %v557_v9 = vrot.slane %v540_v5, %v556_v3  ;;  %v553_v10 = vrot.slane %v540_v5, %v371_v45  ;;  %v569_v38 = vrot.slane %v540_v5, %v568_v30 }
 0x18b   : > { %991 = vmatpush1.bf16.msra.mxu1 %v1381_v11  ;;  %1034 = vmatpush1.bf16.msra.mxu0 %v1383_v13 }
 0x18c   : > { %992 = vmatprep.subr.bf16.mxu1 %v1374_v15  ;;  %1035 = vmatprep.subr.bf16.mxu0 %v1376_v16 }
 0x18f   : > { %993 = vmatpush1.bf16.msra.mxu1 %v1373_v22  ;;  %1036 = vmatpush1.bf16.msra.mxu0 %v1375_v23 }
 0x190   : > { %994 = vmatprep.subr.bf16.mxu1 %v1366_v24  ;;  %1037 = vmatprep.subr.bf16.mxu0 %v1368_v12 }
 0x193   : > { %995 = vmatpush1.bf16.msra.mxu1 %v1365_v27  ;;  %1038 = vmatpush1.bf16.msra.mxu0 %v1367_v28 }
 0x194   : > { %996 = vmatprep.subr.bf16.mxu1 %v1358_v29  ;;  %1039 = vmatprep.subr.bf16.mxu0 %v1360_v1  ;;  %v560_v1 = vsub.s32 4, %v1760_v39 }
 0x197   : > { %997 = vmatpush1.bf16.msra.mxu1 %v1357_v34  ;;  %1040 = vmatpush1.bf16.msra.mxu0 %v1359_v35  ;;  %v572_v34 = vsub.s32 7, %v1760_v39 }
 0x198   : > { %998 = vmatprep.subr.bf16.mxu1 %v1350_v36  ;;  %1041 = vmatprep.subr.bf16.mxu0 %v1352_v37  ;;  %v561_v37 = vrot.slane %v540_v5, %v560_v1 }
 0x19b   : > { %999 = vmatpush1.bf16.msra.mxu1 %v1349_v46  ;;  %1042 = vmatpush1.bf16.msra.mxu0 %v1351_v47  ;;  %v565_v47 = vrot.slane %v540_v5, %v564_v33 }
 0x19c   : > { %1000 = vmatprep.subr.bf16.mxu1 %v1342_v48  ;;  %1043 = vmatprep.subr.bf16.mxu0 %v1344_v49  ;;  %v573_v48 = vrot.slane %v540_v5, %v572_v34 }
 0x19f   : > { %1001 = vmatpush1.bf16.msra.mxu1 %v1341_v54  ;;  %1044 = vmatpush1.bf16.msra.mxu0 %v1343_v55 }
 0x1a0   : > { %1002 = vmatprep.subr.bf16.mxu1 %v1334_v56  ;;  %1045 = vmatprep.subr.bf16.mxu0 %v1336_v57 }
 0x1a3   : > { %1003 = vmatpush1.bf16.msra.mxu1 %v1333_v58  ;;  %1046 = vmatpush1.bf16.msra.mxu0 %v1335_v59 }
 0x1a6   : > { %1021 = vmatmul.mubr.bf16.vlgmr.msra.gmra.mxu1 %v1784_v4  ;;  %1064 = vmatmul.mubr.bf16.vlgmr.msra.gmra.mxu0 %v1784_v4  ;;  %v545_v4 = vrot.slane %v540_v5, %v341_v41 }
 0x246   : > { %v936_v60 = vpop.f32.mrf.mxu1  ;;  %v979_v61 = vpop.f32.mrf.mxu0 }
 0x247   : > { %v937_v20 = vadd.f32 %v936_v60, %v545_v4  ;;  %v980_v21 = vadd.f32 %v979_v61, %v553_v10 }
 0x248   : > { %v938_v62 = vpop.f32.mrf.mxu1  ;;  %v981_v63 = vpop.f32.mrf.mxu0 }
 0x249   : > { %v939_v15 = vadd.f32 %v938_v62, %v549_v8  ;;  %v982_v16 = vadd.f32 %v981_v63, %v557_v9  ;;  %v1074_v18 = vmax.f32 %v937_v20, 0.0  ;;  %v1076_v25 = vmax.f32 %v980_v21, 0.0 }
 0x24a   : > { %v940_v0 = vpop.f32.mrf.mxu1  ;;  %v983_v2 = vpop.f32.mrf.mxu0 }
 0x24b   : > { %v941_v17 = vadd.f32 %v940_v0, %v545_v4  ;;  %v984_v19 = vadd.f32 %v983_v2, %v553_v10  ;;  %v1075_v24 = vmax.f32 %v939_v15, 0.0  ;;  %v1077_v12 = vmax.f32 %v982_v16, 0.0 }
 0x24c   : > { %v942_v6 = vpop.f32.mrf.mxu1  ;;  %v985_v7 = vpop.f32.mrf.mxu0 }
 0x24d   : > { %v943_v11 = vadd.f32 %v942_v6, %v549_v8  ;;  %v986_v13 = vadd.f32 %v985_v7, %v557_v9  ;;  %v1082_v40 = vmax.f32 %v941_v17, 0.0  ;;  %v1084_v14 = vmax.f32 %v984_v19, 0.0 }
 0x24f   : > { %v1083_v22 = vmax.f32 %v943_v11, 0.0  ;;  %v1085_v23 = vmax.f32 %v986_v13, 0.0  ;;  %v1091_v27 = vmax.f32 %v1074_v18, %v1082_v40  ;;  %v1105_v45 = vmax.f32 %v1076_v25, %v1084_v14 }
 0x251   : > { %v1098_v41 = vmax.f32 %v1075_v24, %v1083_v22  ;;  %v1112_v26 = vmax.f32 %v1077_v12, %v1085_v23  ;;  %v1092_v31 = vrot.slane %v1091_v27, 4  ;;  %v1106_v32 = vrot.slane %v1105_v45, 4 }
 0x252   : > { %v1615_v22 = vmov 1966171168  }
 0x253   : > { %v1099_v28 = vrot.slane %v1098_v41, 4  ;;  %v1113_v29 = vrot.slane %v1112_v26, 4  ;;  %v1093_v42 = vmax.f32 %v1091_v27, %v1092_v31  ;;  %v1107_v43 = vmax.f32 %v1105_v45, %v1106_v32 }
 0x254   : > { %v1160_v23 = vunpack.c.l.s4 %v1615_v22 }
 0x255   : > { %v1100_v35 = vmax.f32 %v1098_v41, %v1099_v28  ;;  %v1114_v36 = vmax.f32 %v1112_v26, %v1113_v29  ;;  %v1094_v55 = vrot.slane %v1093_v42, 2  ;;  %v1108_v56 = vrot.slane %v1107_v43, 2 }
 0x256   : > { %v1161_v1 = vunpack.c.0.s8 %v1160_v23 }
 0x257   : > { %v1101_v49 = vrot.slane %v1100_v35, 2  ;;  %v1115_v50 = vrot.slane %v1114_v36, 2  ;;  %v1095_v10 = vmax.f32 %v1093_v42, %v1094_v55  ;;  %v1109_v11 = vmax.f32 %v1107_v43, %v1108_v56 }
 0x259   : > { %v1102_v63 = vmax.f32 %v1100_v35, %v1101_v49  ;;  %v1116_v0 = vmax.f32 %v1114_v36, %v1115_v50  ;;  %v1096_v25 = vrot.slane %v1095_v10, 1  ;;  %v1110_v41 = vrot.slane %v1109_v11, 1 }
 0x25b   : > { %v1103_v21 = vrot.slane %v1102_v63, 1  ;;  %v1117_v24 = vrot.slane %v1116_v0, 1  ;;  %v1097_v35 = vmax.f32 %v1095_v10, %v1096_v25  ;;  %v1111_v36 = vmax.f32 %v1109_v11, %v1110_v41 }
 0x25d   : > { %v1104_v29 = vmax.f32 %v1102_v63, %v1103_v21  ;;  %v1118_v30 = vmax.f32 %v1116_v0, %v1117_v24 }
 0x266   : > { %v1022_v44 = vpop.f32.mrf.mxu1  ;;  %v1065_v46 = vpop.f32.mrf.mxu0 }
 0x267   : > { %v1023_v51 = vadd.f32 %v1022_v44, %v561_v37  ;;  %v1066_v52 = vadd.f32 %v1065_v46, %v569_v38  ;;  %v1155_v44 = vcombine.low %v1097_v35, %v1104_v29  ;;  %v1164_v46 = vsub.s32 %v1161_v1, %v1760_v39 }
 0x268   : > { %v1024_v53 = vpop.f32.mrf.mxu1  ;;  %v1067_v54 = vpop.f32.mrf.mxu0 }
 0x269   : > { %v1025_v57 = vadd.f32 %v1024_v53, %v565_v47  ;;  %v1068_v58 = vadd.f32 %v1067_v54, %v573_v48  ;;  %v1078_v2 = vmax.f32 %v1023_v51, 0.0  ;;  %v1080_v3 = vmax.f32 %v1066_v52, 0.0 }
 0x26a   : > { %v1026_v59 = vpop.f32.mrf.mxu1  ;;  %v1069_v60 = vpop.f32.mrf.mxu0  ;;  %v1165_v54 = vrot.slane %v1155_v44, %v1164_v46 }
 0x26b   : > { %v1027_v61 = vadd.f32 %v1026_v59, %v561_v37  ;;  %v1070_v62 = vadd.f32 %v1069_v60, %v569_v38  ;;  %v1079_v13 = vmax.f32 %v1025_v57, 0.0  ;;  %v1081_v15 = vmax.f32 %v1068_v58, 0.0 }
 0x26c   : > { %v1028_v6 = vpop.f32.mrf.mxu1  ;;  %v1071_v5 = vpop.f32.mrf.mxu0 }
 0x26d   : > { %v1086_v7 = vmax.f32 %v1027_v61, 0.0  ;;  %v1088_v8 = vmax.f32 %v1070_v62, 0.0  ;;  %v1029_v9 = vadd.f32 %v1028_v6, %v565_v47  ;;  %v1072_v4 = vadd.f32 %v1071_v5, %v573_v48 }
 0x26e   : > { %v1156_v47 = vcombine.low %v1111_v36, %v1118_v30 }
 0x26f   : > { %v1119_v16 = vmax.f32 %v1078_v2, %v1086_v7  ;;  %v1133_v17 = vmax.f32 %v1080_v3, %v1088_v8  ;;  %v1087_v19 = vmax.f32 %v1029_v9, 0.0  ;;  %v1089_v20 = vmax.f32 %v1072_v4, 0.0 }
 0x270   : > { %v1172_v55 = vrot.slane %v1156_v47, %v1164_v46 }
 0x271   : > { %v1120_v12 = vrot.slane %v1119_v16, 4  ;;  %v1134_v40 = vrot.slane %v1133_v17, 4  ;;  %v1126_v14 = vmax.f32 %v1079_v13, %v1087_v19  ;;  %v1140_v18 = vmax.f32 %v1081_v15, %v1089_v20 }
 0x272   : > { %v1187_v63 = vcombine.low %v1165_v54, %v1172_v55 }
 0x273   : > { %v1121_v26 = vmax.f32 %v1119_v16, %v1120_v12  ;;  %v1135_v27 = vmax.f32 %v1133_v17, %v1134_v40  ;;  %v1127_v45 = vrot.slane %v1126_v14, 4  ;;  %v1141_v28 = vrot.slane %v1140_v18, 4 }
 0x274   : > { %v1195_v2 = vrot.slane %v1187_v63, %v1164_v46 }
 0x275   : > { %v1122_v31 = vrot.slane %v1121_v26, 2  ;;  %v1136_v32 = vrot.slane %v1135_v27, 2  ;;  %v1128_v33 = vmax.f32 %v1126_v14, %v1127_v45  ;;  %v1142_v34 = vmax.f32 %v1140_v18, %v1141_v28 }
 0x277   : > { %v1123_v37 = vmax.f32 %v1121_v26, %v1122_v31  ;;  %v1137_v38 = vmax.f32 %v1135_v27, %v1136_v32  ;;  %v1129_v42 = vrot.slane %v1128_v33, 2  ;;  %v1143_v43 = vrot.slane %v1142_v34, 2 }
 0x279   : > { %v1124_v48 = vrot.slane %v1123_v37, 1  ;;  %v1138_v49 = vrot.slane %v1137_v38, 1  ;;  %v1130_v50 = vmax.f32 %v1128_v33, %v1129_v42  ;;  %v1144_v51 = vmax.f32 %v1142_v34, %v1143_v43 }
 0x27b   : > { %v1131_v52 = vrot.slane %v1130_v50, 1  ;;  %v1145_v53 = vrot.slane %v1144_v51, 1  ;;  %v1125_v56 = vmax.f32 %v1123_v37, %v1124_v48  ;;  %v1139_v57 = vmax.f32 %v1137_v38, %v1138_v49 }
 0x27d   : > { %v1132_v58 = vmax.f32 %v1130_v50, %v1131_v52  ;;  %v1146_v59 = vmax.f32 %v1144_v51, %v1145_v53 }
 0x27f   : > { %v1157_v60 = vcombine.low %v1125_v56, %v1132_v58  ;;  %v1158_v61 = vcombine.low %v1139_v57, %v1146_v59 }
 0x281   : > { %v1179_v62 = vrot.slane %v1157_v60, %v1164_v46  ;;  %v1186_v39 = vrot.slane %v1158_v61, %v1164_v46 }
 0x283   : > { %v1188_v0 = vcombine.low %v1179_v62, %v1186_v39 }
 0x285   : > { %v1202_v3 = vrot.slane %v1188_v0, %v1164_v46 }
 0x287   : > { %v1203_v6 = vcombine.low %v1195_v2, %v1202_v3 }
 0x289   : > { %1211 = vst [vmem:[%s309_s22] sm:$0xff] %v1203_v6 }
 0x28a   : > { %1538 = shalt.err (!%p1535_p3)
}
 0x28b   : > { %s1539_s18 = scalar_lea.hbm %s1225_s10, 128  ;;  %s1543_s21 = scalar_lea.hbm %s1853_s7, 256 }
 0x28c   : > { %p1540_p5 = scmp.ne.s32.totalorder %s1225_s10, %s1539_s18  ;;  %p1544_p9 = scmp.lt.s32.totalorder %s1225_s10, %s1853_s7 }
 0x28d   : > { %p1545_p12 = scmp.lt.s32.totalorder %s1543_s21, %s1539_s18 }
 0x28e   : > { %p1541_p6 = pnand %p1540_p5, %p1697_p4 }
 0x28f   : > { %p1546_p10 = por %p1545_p12, %p1544_p9 }
 0x290   : > { %p1542_p7 = pneg %p1541_p6 }
 0x292   : > { %p1547_p11 = pnand %p1546_p10, %p1542_p7 }
 0x294   : > { %1550 = shalt.err (!%p1547_p11)
}
 0x295   : > { %1421 = dma.vmem_to_hbm [thread:$0]  (%p1697_p4), %s1228_s23, 128, %s1225_s10, %s1213_s12  }
 0x296 PF: > { %p1433_p13 = scmp.ge.s32.totalorder %s1605_s29, 2  ;;  %s1239_s8 = sand.u32 1, %s1585_s24  }
 0x297   : > { %s1240_s15 = scalar_lea.sflag [#allocation5], %s1239_s8 }
 0x298   : > { %p1428_p0 = pnand %p1433_p13, %p1704_p8 }
 0x29a   : > { %p1429_p1 = pneg %p1428_p0 }
 0x29c   : > { %1580 = dma.done.wait (%p1429_p1), %s1240_s15, 128  }
 0x29d   : > { %1582 = vsyncadd (%p1429_p1), %s1240_s15, 4294967168  ;;  %s21_s29 = sadd.s32 1, %s1605_s29   ;;  %s1858_s24 = smov %s1589_s25 }
 0x29e   : > { %p18_p2 = scmp.ge.s32.totalorder %s21_s29, 4   ;;  %s1859_s25 = smov %s1593_s26 }
 0x29f   : > { %s1860_s26 = smov %s1710_s14  ;;  %s1861_s27 = smov %s1601_s28 }
 0x2a0   : > { %s1862_s28 = smov %s1864_s9  ;;  %20 = sbr.rel (!%p18_p2) target bundleno = 5 (0x5), region = 96 }
 0x2a5   :  { %1245 = vsyncpa [#allocation4], 1 }
 0x2a6   :  { %1247 = vsyncpa [#allocation4 + $0x1], 1 }
 0x2a7   :  { %1248 = vsyncpa [#allocation5], 1 }
 0x2a8   :  { %1250 = vsyncpa [#allocation5 + $0x1], 1 }

</bundles_post_ra>
